<compile_context>
chip_gen: v7x
topology: tpu7x:2x2x1
jax: 0.10.0
libtpu: 0.0.40
codegen_flags: <defaults>
</compile_context>

<pallas_src>
import functools

import jax
import jax.numpy as jnp
from jax import lax
from jax.experimental import pallas as pl
from jax.experimental.pallas import tpu as pltpu


def _round_up(n: int, m: int) -> int:
    return ((n + m - 1) // m) * m


def _is_v5e() -> bool:
    try:
        kind = jax.devices()[0].device_kind.lower()
    except Exception:
        return False
    return ("v5 lite" in kind) or ("v5e" in kind) or ("v5litepod" in kind)


def _vmem_capacity_bytes() -> int:
    try:
        return int(pltpu.get_tpu_info().vmem_capacity_bytes)
    except Exception:
        # Conservative fallback: v7x per-TensorCore capacity.
        return 64 * (1 << 20)


def _choose_tb(B: int, compute_dtype, block_batch: int = 256) -> int:
    """Batch tile: MXU-filling, sublane-aligned, low padding waste, >=2 tiles
    (when free) so both v7x TensorCores get work."""
    sub = 16 if jnp.dtype(compute_dtype).itemsize == 2 else 8  # bf16 packs 16 rows/vreg
    cap = max(sub, min(block_batch, _round_up(B, sub)))
    cands = [c for c in (512, 256, 128, 64, 32, 16, 8)
             if c % sub == 0 and sub <= c <= cap]
    if not cands:
        cands = [sub]
    tb = None
    for c in cands:                                   # descending -> prefer MXU fill
        if _round_up(B, c) - B <= c // 2:             # but waste < half a tile
            tb = c
            break
    if tb is None:                                    # awkward B: minimize padded rows
        tb = min(cands, key=lambda c: (_round_up(B, c), -c))
    # If a single grid step would result, halve (down to 128) when it costs no
    # extra padding, so the 'parallel' batch axis can feed both v7x cores.
    while (_round_up(B, tb) // tb) == 1 and tb // 2 >= max(128, sub) \
            and _round_up(B, tb // 2) == _round_up(B, tb):
        tb //= 2
    return tb


def _const_block_spec(shape):
    """BlockSpec for a grid-invariant (resident) operand: single-buffered."""
    zeros = (0,) * len(shape)
    index_map = lambda i, _z=zeros: _z
    try:
        return pl.BlockSpec(shape, index_map, pipeline_mode=pl.Buffered(1))
    except (TypeError, AttributeError):   # older JAX without pipeline_mode
        return pl.BlockSpec(shape, index_map)


def _fused_mlp_kernel(x_ref, wI_ref, bI_ref, wH_ref, bH_ref, wO_ref, bO_ref,
                      o_ref, act_ref, *, num_layers: int, compute_dtype, nsplit: int):
    """Whole MLP for one batch tile; activation stays resident in VMEM scratch.

    Matmuls feed the MXU in `compute_dtype` (bf16 or f32) with f32 accumulation;
    bias-add is f32; tanh runs in the activation-scratch dtype.  The batch tile
    is split into `nsplit` sub-tiles so one sub-tile's tanh (VPU/EUP) overlaps
    the next sub-tile's matmul (MXU)."""
    tb = act_ref.shape[0]
    half = tb // nsplit
    act_dtype = act_ref.dtype

    def rows(r):
        return pl.ds(r * half, half)

    # ---- fcI + tanh ----
    bI = bI_ref[...]
    wI = wI_ref[...]
    y = [jnp.dot(x_ref[rows(r), :].astype(compute_dtype), wI,
                 preferred_element_type=jnp.float32) for r in range(nsplit)]
    for r in range(nsplit):
        act_ref[rows(r), :] = jnp.tanh((y[r] + bI).astype(act_dtype))

    # ---- hidden layers + tanh (stacked weights [L, H, H]) ----
    def layer(l, carry):
        w = wH_ref[l]
        b = bH_ref[l]
        a = [act_ref[rows(r), :].astype(compute_dtype) for r in range(nsplit)]
        yl = [jnp.dot(a[r], w, preferred_element_type=jnp.float32)
              for r in range(nsplit)]
        for r in range(nsplit):
            act_ref[rows(r), :] = jnp.tanh((yl[r] + b).astype(act_dtype))
        return carry

    if num_layers > 0:
        # Full unroll only for small L; partial unroll keeps code size bounded.
        unroll = True if num_layers <= 8 else 4
        lax.fori_loop(0, num_layers, layer, 0, unroll=unroll)

    # ---- fco (no activation) ----
    bO = bO_ref[...]
    wO = wO_ref[...]
    for r in range(nsplit):
        yo = jnp.dot(act_ref[rows(r), :].astype(compute_dtype), wO,
                     preferred_element_type=jnp.float32)
        o_ref[rows(r), :] = (yo + bO).astype(o_ref.dtype)


def ann_forward(params, x, *, compute_dtype=jnp.bfloat16, block_batch=256):
    """Fused forward pass matching ANN.forward semantics.

    x: [B, input_size] -> [B, output_size]
    """
    wI, bI = params["fcI"]
    wO, bO = params["fco"]
    hidden = params["hidden"]
    L = len(hidden)

    B, Fin = x.shape
    H = wI.shape[1]
    Fout = wO.shape[1]
    out_dtype = bO.dtype

    # Lane/sublane-aligned padded sizes.
    Fin_p = _round_up(Fin, 128)
    Hp = _round_up(H, 128)
    Fout_p = _round_up(Fout, 128)
    TB = _choose_tb(B, compute_dtype, block_batch)
    Bp = _round_up(B, TB)

    # Activation/tanh dtype: bf16 on v6e/v7x when computing in bf16, f32 on v5e.
    if jnp.dtype(compute_dtype) == jnp.dtype(jnp.bfloat16) and not _is_v5e():
        act_dtype = jnp.bfloat16
    else:
        act_dtype = jnp.float32

    # Sub-tile split so tanh (EUP/VPU) hides behind the next sub-tile's matmul.
    sub = 16 if jnp.dtype(compute_dtype).itemsize == 2 else 8
    nsplit = 2 if (TB % (2 * sub) == 0 and TB >= 2 * sub) else 1

    # Stack hidden weights/biases; tiny dummy if L == 0 (loop is skipped then,
    # so we avoid DMAing/buffering an Hp^2 block of zeros).
    if L > 0:
        wH = jnp.stack([w for (w, _) in hidden])  # [L, H, H]
        bH = jnp.stack([b for (_, b) in hidden])  # [L, 1, H]
        wH_p = jnp.pad(wH, ((0, 0), (0, Hp - H), (0, Hp - H)))
        bH_p = jnp.pad(bH, ((0, 0), (0, 0), (0, Hp - H)))
    else:
        wH_p = jnp.zeros((1, 8, 128), wI.dtype)
        bH_p = jnp.zeros((1, 1, 128), bI.dtype)

    # Zero-pad to lane-dense tiles (padding is sliced off at the end; zero
    # padding keeps the math exact because padded rows/cols contribute 0 and
    # tanh(0)=0 keeps padded hidden columns inert).
    x_p = jnp.pad(x, ((0, Bp - B), (0, Fin_p - Fin)))
    wI_p = jnp.pad(wI, ((0, Fin_p - Fin), (0, Hp - H)))
    bI_p = jnp.pad(bI, ((0, 0), (0, Hp - H)))
    wO_p = jnp.pad(wO, ((0, Hp - H), (0, Fout_p - Fout)))
    bO_p = jnp.pad(bO, ((0, 0), (0, Fout_p - Fout)))

    # MXU inputs in compute_dtype; biases (and accumulation) in f32.
    x_p = x_p.astype(compute_dtype)
    wI_p = wI_p.astype(compute_dtype)
    wH_p = wH_p.astype(compute_dtype)
    wO_p = wO_p.astype(compute_dtype)
    bI_p = bI_p.astype(jnp.float32)
    bH_p = bH_p.astype(jnp.float32)
    bO_p = bO_p.astype(jnp.float32)

    kernel = functools.partial(_fused_mlp_kernel, num_layers=L,
                               compute_dtype=compute_dtype, nsplit=nsplit)

    # Per-TensorCore VMEM estimate: single-buffered resident weights/biases +
    # double-buffered x/out batch tiles + activation scratch.
    itemsize = jnp.dtype(compute_dtype).itemsize
    weight_bytes = (wI_p.size + wH_p.size + wO_p.size) * itemsize
    bias_bytes = (bI_p.size + bH_p.size + bO_p.size) * 4
    io_bytes = 2 * TB * Fin_p * itemsize + 2 * TB * Fout_p * jnp.dtype(out_dtype).itemsize
    scratch_bytes = TB * Hp * jnp.dtype(act_dtype).itemsize
    est = weight_bytes + bias_bytes + io_bytes + scratch_bytes

    # Always set the limit; never request the full physical VMEM (v7x = 64 MiB/TC).
    vmem_cap = _vmem_capacity_bytes()
    vmem_limit = max(16 * (1 << 20), int(1.5 * est) + (2 << 20))
    vmem_limit = min(vmem_limit, int(0.85 * vmem_cap))
    # TODO(synk): when L*Hp^2*itemsize approaches ~1/3 of per-TC VMEM (v7x 64 MiB),
    # stream hidden-layer weights instead of keeping the stack resident (layer
    # axis in the grid, or wH in HBM via memory_space=pl.ANY + manual
    # pltpu.make_async_copy double-buffering of wH[l+1] behind layer l's matmul).
    compiler_params = pltpu.CompilerParams(
        dimension_semantics=("parallel",),
        vmem_limit_bytes=vmem_limit,
    )

    out_p = pl.pallas_call(
        kernel,
        out_shape=jax.ShapeDtypeStruct((Bp, Fout_p), out_dtype),
        grid=(Bp // TB,),
        in_specs=[
            pl.BlockSpec((TB, Fin_p), lambda i: (i, 0)),   # x batch tile (pipelined)
            _const_block_spec((Fin_p, Hp)),                # fcI W  (resident, 1-buf)
            _const_block_spec((1, Hp)),                    # fcI b
            _const_block_spec(wH_p.shape),                 # stacked hidden W
            _const_block_spec(bH_p.shape),                 # stacked hidden b
            _const_block_spec((Hp, Fout_p)),               # fco W
            _const_block_spec((1, Fout_p)),                # fco b
        ],
        out_specs=pl.BlockSpec((TB, Fout_p), lambda i: (i, 0)),
        scratch_shapes=[pltpu.VMEM((TB, Hp), act_dtype)],  # running activation
        compiler_params=compiler_params,
    )(x_p, wI_p, bI_p, wH_p, bH_p, wO_p, bO_p)

    return out_p[:B, :Fout]


def init_ann_params(key, input_size, hidden_size, num_layers, output_size,
                    dtype=jnp.float32):
    """Deterministic parameter init mirroring nn.Linear's U(-1/sqrt(fan_in), ...)."""
    def linear_init(k, fan_in, fan_out):
        kw, kb = jax.random.split(k)
        bound = 1.0 / jnp.sqrt(jnp.asarray(fan_in, dtype))
        # stored as [in, out] (transposed relative to PyTorch's [out, in])
        w = jax.random.uniform(kw, (fan_in, fan_out), dtype, -bound, bound)
        b = jax.random.uniform(kb, (1, fan_out), dtype, -bound, bound)
        return w, b

    keys = jax.random.split(key, num_layers + 2)
    return {
        "fcI": linear_init(keys[0], input_size, hidden_size),
        "hidden": [linear_init(keys[1 + i], hidden_size, hidden_size)
                   for i in range(num_layers)],
        "fco": linear_init(keys[num_layers + 1], hidden_size, output_size),
    }


if __name__ == "__main__":
    # Pure-JAX reference (same params, same math as ANN.forward).
    def ref_forward(params, x):
        w, b = params["fcI"]
        out = jnp.tanh(x @ w + b)
        for (w, b) in params["hidden"]:
            out = jnp.tanh(out @ w + b)
        w, b = params["fco"]
        return out @ w + b

    key = jax.random.PRNGKey(0)
    k_params, k_x, k_params0, k_x0 = jax.random.split(key, 4)

    # Config A: batch=8, input=16, hidden=32, layers=2, output=4.
    batch, input_size, hidden_size, num_layers, output_size = 8, 16, 32, 2, 4
    params = init_ann_params(k_params, input_size, hidden_size, num_layers,
                             output_size)
    x = jax.random.normal(k_x, (batch, input_size), dtype=jnp.float32)
    ref = ref_forward(params, x)

    # f32 path: exact match to reference.
    fwd_f32 = jax.jit(functools.partial(ann_forward, compute_dtype=jnp.float32))
    out = jax.block_until_ready(fwd_f32(params, x))
    assert out.shape == (batch, output_size)
    assert jnp.allclose(out, ref, atol=1e-5, rtol=1e-5)

    # Default bf16 MXU-input path (f32 accumulate, f32 bias): looser tolerance.
    fwd_bf16 = jax.jit(ann_forward)
    out_bf16 = jax.block_until_ready(fwd_bf16(params, x))
    assert out_bf16.shape == (batch, output_size)
    assert jnp.allclose(out_bf16, ref, atol=2e-1, rtol=2e-1)

    # Config B: no hidden layers + odd batch (exercises dummy-wH path & padding).
    params0 = init_ann_params(k_params0, input_size, hidden_size, 0, output_size)
    x0 = jax.random.normal(k_x0, (5, input_size), dtype=jnp.float32)
    out0 = jax.block_until_ready(fwd_f32(params0, x0))
    assert out0.shape == (5, output_size)
    assert jnp.allclose(out0, ref_forward(params0, x0), atol=1e-5, rtol=1e-5)

    print("KERNEL_OK")
</pallas_src>

<mosaic_0001>
module attributes {stable_mosaic.version = 11 : i64} {
  func.func @_fused_mlp_kernel(%arg0: i32, %arg1: memref<8x128xf32, #tpu.memory_space<vmem>>, %arg2: memref<128x128xf32, #tpu.memory_space<vmem>>, %arg3: memref<1x128xf32, #tpu.memory_space<vmem>>, %arg4: memref<2x128x128xf32, #tpu.memory_space<vmem>>, %arg5: memref<2x1x128xf32, #tpu.memory_space<vmem>>, %arg6: memref<128x128xf32, #tpu.memory_space<vmem>>, %arg7: memref<1x128xf32, #tpu.memory_space<vmem>>, %arg8: memref<8x128xf32, #tpu.memory_space<vmem>>, %arg9: memref<8x128xf32, #tpu.memory_space<vmem>>) attributes {dimension_semantics = [#tpu.dimension_semantics<parallel>], iteration_bounds = array<i64: 1>, scalar_prefetch = 0 : i64, scratch_operands = 1 : i64, tpu.core_type = #tpu.core_type<tc>, window_params = [{transform_indices = @transform_0, window_bounds = array<i64: 8, 128>}, {pipeline_mode = #tpu.pipeline_mode<synchronous>, transform_indices = @transform_1, window_bounds = array<i64: 128, 128>}, {pipeline_mode = #tpu.pipeline_mode<synchronous>, transform_indices = @transform_2, window_bounds = array<i64: 1, 128>}, {pipeline_mode = #tpu.pipeline_mode<synchronous>, transform_indices = @transform_3, window_bounds = array<i64: 2, 128, 128>}, {pipeline_mode = #tpu.pipeline_mode<synchronous>, transform_indices = @transform_4, window_bounds = array<i64: 2, 1, 128>}, {pipeline_mode = #tpu.pipeline_mode<synchronous>, transform_indices = @transform_5, window_bounds = array<i64: 128, 128>}, {pipeline_mode = #tpu.pipeline_mode<synchronous>, transform_indices = @transform_6, window_bounds = array<i64: 1, 128>}, {transform_indices = @transform_7, window_bounds = array<i64: 8, 128>}]} {
    %c0 = arith.constant 0 : index
    %c0_0 = arith.constant 0 : index
    %0 = vector.load %arg3[%c0, %c0_0] : memref<1x128xf32, #tpu.memory_space<vmem>>, vector<1x128xf32>
    %c0_1 = arith.constant 0 : index
    %c0_2 = arith.constant 0 : index
    %1 = vector.load %arg2[%c0_1, %c0_2] : memref<128x128xf32, #tpu.memory_space<vmem>>, vector<128x128xf32>
    %c0_3 = arith.constant 0 : index
    %c0_4 = arith.constant 0 : index
    %2 = vector.load %arg1[%c0_3, %c0_4] : memref<8x128xf32, #tpu.memory_space<vmem>>, vector<8x128xf32>
    %cst = arith.constant dense<0.000000e+00> : vector<8x128xf32>
    %3 = tpu.matmul %2, %1, %cst {dimension_numbers = #tpu.dot_dimension_numbers<[1], [0], [0], [1], [0, 0, 1, 1], [], []>} : vector<8x128xf32>, vector<128x128xf32>, vector<8x128xf32> -> vector<8x128xf32>
    %4 = vector.broadcast %0 : vector<1x128xf32> to vector<8x128xf32>
    %5 = arith.addf %3, %4 : vector<8x128xf32>
    %6 = math.tanh %5 : vector<8x128xf32>
    %c0_5 = arith.constant 0 : index
    %c0_6 = arith.constant 0 : index
    %7 = vector.load %arg9[%c0_5, %c0_6] : memref<8x128xf32, #tpu.memory_space<vmem>>, vector<8x128xf32>
    tpu.vector_store %arg9[%c0_5, %c0_6], %6 {strides = array<i32>} : memref<8x128xf32, #tpu.memory_space<vmem>>, vector<8x128xf32>,
    %c0_i32 = arith.constant 0 : i32
    %8 = arith.index_cast %c0_i32 : i32 to index
    %c0_7 = arith.constant 0 : index
    %c0_8 = arith.constant 0 : index
    %9 = vector.load %arg4[%8, %c0_7, %c0_8] : memref<2x128x128xf32, #tpu.memory_space<vmem>>, vector<1x128x128xf32>
    %10 = vector.shape_cast %9 : vector<1x128x128xf32> to vector<128x128xf32>
    %11 = arith.index_cast %c0_i32 : i32 to index
    %c0_9 = arith.constant 0 : index
    %c0_10 = arith.constant 0 : index
    %12 = vector.load %arg5[%11, %c0_9, %c0_10] : memref<2x1x128xf32, #tpu.memory_space<vmem>>, vector<1x1x128xf32>
    %13 = vector.shape_cast %12 : vector<1x1x128xf32> to vector<1x128xf32>
    %c0_11 = arith.constant 0 : index
    %c0_12 = arith.constant 0 : index
    %14 = vector.load %arg9[%c0_11, %c0_12] : memref<8x128xf32, #tpu.memory_space<vmem>>, vector<8x128xf32>
    %cst_13 = arith.constant dense<0.000000e+00> : vector<8x128xf32>
    %15 = tpu.matmul %14, %10, %cst_13 {dimension_numbers = #tpu.dot_dimension_numbers<[1], [0], [0], [1], [0, 0, 1, 1], [], []>} : vector<8x128xf32>, vector<128x128xf32>, vector<8x128xf32> -> vector<8x128xf32>
    %16 = vector.broadcast %13 : vector<1x128xf32> to vector<8x128xf32>
    %17 = arith.addf %15, %16 : vector<8x128xf32>
    %18 = math.tanh %17 : vector<8x128xf32>
    %c0_14 = arith.constant 0 : index
    %c0_15 = arith.constant 0 : index
    %19 = vector.load %arg9[%c0_14, %c0_15] : memref<8x128xf32, #tpu.memory_space<vmem>>, vector<8x128xf32>
    tpu.vector_store %arg9[%c0_14, %c0_15], %18 {strides = array<i32>} : memref<8x128xf32, #tpu.memory_space<vmem>>, vector<8x128xf32>,
    %c1_i32 = arith.constant 1 : i32
    %20 = arith.index_cast %c1_i32 : i32 to index
    %c0_16 = arith.constant 0 : index
    %c0_17 = arith.constant 0 : index
    %21 = vector.load %arg4[%20, %c0_16, %c0_17] : memref<2x128x128xf32, #tpu.memory_space<vmem>>, vector<1x128x128xf32>
    %22 = vector.shape_cast %21 : vector<1x128x128xf32> to vector<128x128xf32>
    %23 = arith.index_cast %c1_i32 : i32 to index
    %c0_18 = arith.constant 0 : index
    %c0_19 = arith.constant 0 : index
    %24 = vector.load %arg5[%23, %c0_18, %c0_19] : memref<2x1x128xf32, #tpu.memory_space<vmem>>, vector<1x1x128xf32>
    %25 = vector.shape_cast %24 : vector<1x1x128xf32> to vector<1x128xf32>
    %c0_20 = arith.constant 0 : index
    %c0_21 = arith.constant 0 : index
    %26 = vector.load %arg9[%c0_20, %c0_21] : memref<8x128xf32, #tpu.memory_space<vmem>>, vector<8x128xf32>
    %cst_22 = arith.constant dense<0.000000e+00> : vector<8x128xf32>
    %27 = tpu.matmul %26, %22, %cst_22 {dimension_numbers = #tpu.dot_dimension_numbers<[1], [0], [0], [1], [0, 0, 1, 1], [], []>} : vector<8x128xf32>, vector<128x128xf32>, vector<8x128xf32> -> vector<8x128xf32>
    %28 = vector.broadcast %25 : vector<1x128xf32> to vector<8x128xf32>
    %29 = arith.addf %27, %28 : vector<8x128xf32>
    %30 = math.tanh %29 : vector<8x128xf32>
    %c0_23 = arith.constant 0 : index
    %c0_24 = arith.constant 0 : index
    %31 = vector.load %arg9[%c0_23, %c0_24] : memref<8x128xf32, #tpu.memory_space<vmem>>, vector<8x128xf32>
    tpu.vector_store %arg9[%c0_23, %c0_24], %30 {strides = array<i32>} : memref<8x128xf32, #tpu.memory_space<vmem>>, vector<8x128xf32>,
    %c2_i32 = arith.constant 2 : i32
    %c0_25 = arith.constant 0 : index
    %c0_26 = arith.constant 0 : index
    %32 = vector.load %arg7[%c0_25, %c0_26] : memref<1x128xf32, #tpu.memory_space<vmem>>, vector<1x128xf32>
    %c0_27 = arith.constant 0 : index
    %c0_28 = arith.constant 0 : index
    %33 = vector.load %arg6[%c0_27, %c0_28] : memref<128x128xf32, #tpu.memory_space<vmem>>, vector<128x128xf32>
    %c0_29 = arith.constant 0 : index
    %c0_30 = arith.constant 0 : index
    %34 = vector.load %arg9[%c0_29, %c0_30] : memref<8x128xf32, #tpu.memory_space<vmem>>, vector<8x128xf32>
    %cst_31 = arith.constant dense<0.000000e+00> : vector<8x128xf32>
    %35 = tpu.matmul %34, %33, %cst_31 {dimension_numbers = #tpu.dot_dimension_numbers<[1], [0], [0], [1], [0, 0, 1, 1], [], []>} : vector<8x128xf32>, vector<128x128xf32>, vector<8x128xf32> -> vector<8x128xf32>
    %36 = vector.broadcast %32 : vector<1x128xf32> to vector<8x128xf32>
    %37 = arith.addf %35, %36 : vector<8x128xf32>
    %c0_32 = arith.constant 0 : index
    %c0_33 = arith.constant 0 : index
    %38 = vector.load %arg8[%c0_32, %c0_33] : memref<8x128xf32, #tpu.memory_space<vmem>>, vector<8x128xf32>
    tpu.vector_store %arg8[%c0_32, %c0_33], %37 {strides = array<i32>} : memref<8x128xf32, #tpu.memory_space<vmem>>, vector<8x128xf32>,
    return
  }
  func.func @transform_0(%arg0: i32) -> (i32, i32) {
    %c0_i32 = arith.constant 0 : i32
    %c0_i32_0 = arith.constant 0 : i32
    return %arg0, %c0_i32 : i32, i32
  }
  func.func @transform_1(%arg0: i32) -> (i32, i32) {
    %c0_i32 = arith.constant 0 : i32
    %c0_i32_0 = arith.constant 0 : i32
    %c0_i32_1 = arith.constant 0 : i32
    return %c0_i32, %c0_i32_0 : i32, i32
  }
  func.func @transform_2(%arg0: i32) -> (i32, i32) {
    %c0_i32 = arith.constant 0 : i32
    %c0_i32_0 = arith.constant 0 : i32
    %c0_i32_1 = arith.constant 0 : i32
    return %c0_i32, %c0_i32_0 : i32, i32
  }
  func.func @transform_3(%arg0: i32) -> (i32, i32, i32) {
    %c0_i32 = arith.constant 0 : i32
    %c0_i32_0 = arith.constant 0 : i32
    %c0_i32_1 = arith.constant 0 : i32
    %c0_i32_2 = arith.constant 0 : i32
    return %c0_i32, %c0_i32_0, %c0_i32_1 : i32, i32, i32
  }
  func.func @transform_4(%arg0: i32) -> (i32, i32, i32) {
    %c0_i32 = arith.constant 0 : i32
    %c0_i32_0 = arith.constant 0 : i32
    %c0_i32_1 = arith.constant 0 : i32
    %c0_i32_2 = arith.constant 0 : i32
    return %c0_i32, %c0_i32_0, %c0_i32_1 : i32, i32, i32
  }
  func.func @transform_5(%arg0: i32) -> (i32, i32) {
    %c0_i32 = arith.constant 0 : i32
    %c0_i32_0 = arith.constant 0 : i32
    %c0_i32_1 = arith.constant 0 : i32
    return %c0_i32, %c0_i32_0 : i32, i32
  }
  func.func @transform_6(%arg0: i32) -> (i32, i32) {
    %c0_i32 = arith.constant 0 : i32
    %c0_i32_0 = arith.constant 0 : i32
    %c0_i32_1 = arith.constant 0 : i32
    return %c0_i32, %c0_i32_0 : i32, i32
  }
  func.func @transform_7(%arg0: i32) -> (i32, i32) {
    %c0_i32 = arith.constant 0 : i32
    %c0_i32_0 = arith.constant 0 : i32
    return %arg0, %c0_i32 : i32, i32
  }
}

</mosaic_0001>

<bundles_post_ra>
// kernel: ann_forward.1
= control target key start
LH: loop header
LB: loop body
LE: loop exit
PB: predicated region body
PF: predicated region fallthrough
CT: control target
= control target key end

     0   :  { %v749_v0 = vmov 0.0|0.0   ;;  %vm750_vm0 = vmmov 0   ;;  %v751_v4 = vmov 0.0   ;;  %s1042_s1 = inlined_call_operand.vmem [shape: f32[128,128], index: 1, kind: input, shape index: {}]   ;;  %s1043_s3 = inlined_call_operand.vmem [shape: f32[2,128,128], index: 3, kind: input, shape index: {}]   ;;  %s1044_s0 = inlined_call_operand.vmem [shape: f32[8,128], index: 0, kind: input, shape index: {}]   ;;  %s1045_s2 = inlined_call_operand.vmem [shape: f32[1,128], index: 2, kind: input, shape index: {}]   ;;  %s1046_s5 = inlined_call_operand.vmem [shape: f32[128,128], index: 5, kind: input, shape index: {}]   ;;  %s1047_s4 = inlined_call_operand.vmem [shape: f32[2,1,128], index: 4, kind: input, shape index: {}]   ;;  %s1048_s6 = inlined_call_operand.vmem [shape: f32[1,128], index: 6, kind: input, shape index: {}]   ;;  %s1049_s7 = inlined_call_operand.vmem [shape: f32[8,128], index: 7, kind: output, shape index: {}]  }
   0x1   :  { %644 = vmatprep.subr.bf16.mxu0 %v749_v0  ;;  %v27_v1 = vld [vmem:[%s1042_s1] sm:$0xff]  ;;  %v28_v2 = vld [vmem:[%s1042_s1 + $0x8] sm:$0xff]  ;;  %v29_v3 = vld [vmem:[%s1042_s1 + $0x10] sm:$0xff]  ;;  %536 = vmatprep.mubr.msk.f32.mxu0 %vm750_vm0, %v751_v4 }
   0x2   :  { %v645_v5 = vpack.c.bf16 %v28_v2, %v27_v1  ;;  %v30_v6 = vld [vmem:[%s1042_s1 + $0x18] sm:$0xff]  ;;  %668 = vmatprep.subr.bf16.mxu1 %v749_v0  ;;  %571 = vmatprep.mubr.msk.f32.mxu1 %vm750_vm0, %v751_v4  ;;  %v31_v8 = vld [vmem:[%s1042_s1 + $0x20] sm:$0xff]  ;;  %v32_v9 = vld [vmem:[%s1042_s1 + $0x28] sm:$0xff] }
   0x3   :  { %v648_v7 = vpack.c.bf16 %v30_v6, %v29_v3  ;;  %v122_v10 = vld [vmem:[%s1043_s3] sm:$0xff]  ;;  %v123_v11 = vld [vmem:[%s1043_s3 + $0x8] sm:$0xff]  ;;  %v124_v12 = vld [vmem:[%s1043_s3 + $0x10] sm:$0xff]  ;;  %v651_v14 = vpack.c.bf16 %v32_v9, %v31_v8 }
   0x4   :  { %646 = vmatpush3.bf16.msra.mxu0 %v645_v5  ;;  %v125_v13 = vld [vmem:[%s1043_s3 + $0x18] sm:$0xff]  ;;  %v669_v15 = vpack.c.bf16 %v123_v11, %v122_v10  ;;  %v33_v16 = vld [vmem:[%s1042_s1 + $0x30] sm:$0xff]  ;;  %v126_v19 = vld [vmem:[%s1043_s3 + $0x20] sm:$0xff] }
   0x5   :  { %647 = vmatprep.subr.bf16.mxu0 %v749_v0  ;;  %v34_v17 = vld [vmem:[%s1042_s1 + $0x38] sm:$0xff]  ;;  %v672_v18 = vpack.c.bf16 %v125_v13, %v124_v12  ;;  %v127_v20 = vld [vmem:[%s1043_s3 + $0x28] sm:$0xff]  ;;  %v35_v22 = vld [vmem:[%s1042_s1 + $0x40] sm:$0xff] }
   0x6   :  { %670 = vmatpush3.bf16.msra.mxu1 %v669_v15  ;;  %v654_v21 = vpack.c.bf16 %v34_v17, %v33_v16  ;;  %v36_v23 = vld [vmem:[%s1042_s1 + $0x48] sm:$0xff]  ;;  %v675_v24 = vpack.c.bf16 %v127_v20, %v126_v19  ;;  %v128_v25 = vld [vmem:[%s1043_s3 + $0x30] sm:$0xff]  ;;  %v129_v26 = vld [vmem:[%s1043_s3 + $0x38] sm:$0xff] }
   0x7   :  { %671 = vmatprep.subr.bf16.mxu1 %v749_v0  ;;  %v657_v27 = vpack.c.bf16 %v36_v23, %v35_v22  ;;  %v37_v28 = vld [vmem:[%s1042_s1 + $0x50] sm:$0xff]  ;;  %v38_v29 = vld [vmem:[%s1042_s1 + $0x58] sm:$0xff]  ;;  %v678_v30 = vpack.c.bf16 %v129_v26, %v128_v25  ;;  %v130_v31 = vld [vmem:[%s1043_s3 + $0x40] sm:$0xff] }
   0x8   :  { %649 = vmatpush3.bf16.msra.mxu0 %v648_v7  ;;  %v131_v32 = vld [vmem:[%s1043_s3 + $0x48] sm:$0xff]  ;;  %v660_v33 = vpack.c.bf16 %v38_v29, %v37_v28  ;;  %v39_v34 = vld [vmem:[%s1042_s1 + $0x60] sm:$0xff]  ;;  %v41_v38 = vld [vmem:[%s1042_s1 + $0x70] sm:$0xff] }
   0x9   :  { %650 = vmatprep.subr.bf16.mxu0 %v749_v0  ;;  %v40_v35 = vld [vmem:[%s1042_s1 + $0x68] sm:$0xff]  ;;  %v681_v36 = vpack.c.bf16 %v131_v32, %v130_v31  ;;  %v42_v39 = vld [vmem:[%s1042_s1 + $0x78] sm:$0xff]  ;;  %v43_v41 = vld [vmem:[%s1044_s0] sm:$0xff] }
   0xa   :  { %673 = vmatpush3.bf16.msra.mxu1 %v672_v18  ;;  %v663_v37 = vpack.c.bf16 %v40_v35, %v39_v34  ;;  %v666_v40 = vpack.c.bf16 %v42_v39, %v41_v38  ;;  %v132_v42 = vld [vmem:[%s1043_s3 + $0x50] sm:$0xff]  ;;  %v133_v43 = vld [vmem:[%s1043_s3 + $0x58] sm:$0xff]  ;;  %v134_v45 = vld [vmem:[%s1043_s3 + $0x60] sm:$0xff] }
   0xb   :  { %674 = vmatprep.subr.bf16.mxu1 %v749_v0  ;;  %v684_v44 = vpack.c.bf16 %v133_v43, %v132_v42  ;;  %v135_v46 = vld [vmem:[%s1043_s3 + $0x68] sm:$0xff]  ;;  %v136_v48 = vld [vmem:[%s1043_s3 + $0x70] sm:$0xff]  ;;  %v137_v49 = vld [vmem:[%s1043_s3 + $0x78] sm:$0xff] }
   0xc   :  { %652 = vmatpush3.bf16.msra.mxu0 %v651_v14  ;;  %v687_v47 = vpack.c.bf16 %v135_v46, %v134_v45  ;;  %v690_v50 = vpack.c.bf16 %v137_v49, %v136_v48  ;;  %v417_v51 = vld [vmem:[%s1043_s3 + $0x80] sm:$0xff]  ;;  %v418_v52 = vld [vmem:[%s1043_s3 + $0x88] sm:$0xff]  ;;  %v419_v53 = vld [vmem:[%s1043_s3 + $0x90] sm:$0xff] }
   0xd   :  { %653 = vmatprep.subr.bf16.mxu0 %v749_v0  ;;  %v693_v54 = vpack.c.bf16 %v418_v52, %v417_v51  ;;  %v420_v55 = vld [vmem:[%s1043_s3 + $0x98] sm:$0xff]  ;;  %v421_v57 = vld [vmem:[%s1043_s3 + $0xa0] sm:$0xff]  ;;  %v422_v58 = vld [vmem:[%s1043_s3 + $0xa8] sm:$0xff] }
   0xe   :  { %676 = vmatpush3.bf16.msra.mxu1 %v675_v24  ;;  %v696_v56 = vpack.c.bf16 %v420_v55, %v419_v53  ;;  %v699_v59 = vpack.c.bf16 %v422_v58, %v421_v57  ;;  %v423_v60 = vld [vmem:[%s1043_s3 + $0xb0] sm:$0xff]  ;;  %v424_v61 = vld [vmem:[%s1043_s3 + $0xb8] sm:$0xff]  ;;  %v425_v63 = vld [vmem:[%s1043_s3 + $0xc0] sm:$0xff] }
   0xf   :  { %677 = vmatprep.subr.bf16.mxu1 %v749_v0  ;;  %v702_v62 = vpack.c.bf16 %v424_v61, %v423_v60  ;;  %v426_v1 = vld [vmem:[%s1043_s3 + $0xc8] sm:$0xff]  ;;  %v415_v3 = vld [vmem:[%s1045_s2] ss:$0 sm:$0xff]  ;;  %v427_v9 = vld [vmem:[%s1043_s3 + $0xd0] sm:$0xff] }
  0x10   :  { %655 = vmatpush3.bf16.msra.mxu0 %v654_v21  ;;  %v705_v2 = vpack.c.bf16 %v426_v1, %v425_v63  ;;  %v428_v10 = vld [vmem:[%s1043_s3 + $0xd8] sm:$0xff]  ;;  %v429_v12 = vld [vmem:[%s1043_s3 + $0xe0] sm:$0xff]  ;;  %v430_v13 = vld [vmem:[%s1043_s3 + $0xe8] sm:$0xff] }
  0x11   :  { %656 = vmatprep.subr.bf16.mxu0 %v749_v0  ;;  %v708_v11 = vpack.c.bf16 %v428_v10, %v427_v9  ;;  %v431_v14 = vld [vmem:[%s1043_s3 + $0xf0] sm:$0xff]  ;;  %v432_v15 = vld [vmem:[%s1043_s3 + $0xf8] sm:$0xff]  ;;  %v317_v17 = vld [vmem:[%s1046_s5] sm:$0xff] }
  0x12   :  { %679 = vmatpush3.bf16.msra.mxu1 %v678_v30  ;;  %v714_v16 = vpack.c.bf16 %v432_v15, %v431_v14  ;;  %v318_v18 = vld [vmem:[%s1046_s5 + $0x8] sm:$0xff]  ;;  %v319_v19 = vld [vmem:[%s1046_s5 + $0x10] sm:$0xff]  ;;  %v320_v21 = vld [vmem:[%s1046_s5 + $0x18] sm:$0xff] }
  0x13   :  { %680 = vmatprep.subr.bf16.mxu1 %v749_v0  ;;  %v717_v20 = vpack.c.bf16 %v318_v18, %v317_v17  ;;  %v720_v22 = vpack.c.bf16 %v320_v21, %v319_v19  ;;  %v321_v23 = vld [vmem:[%s1046_s5 + $0x20] sm:$0xff]  ;;  %v322_v24 = vld [vmem:[%s1046_s5 + $0x28] sm:$0xff]  ;;  %v323_v26 = vld [vmem:[%s1046_s5 + $0x30] sm:$0xff] }
  0x14   :  { %658 = vmatpush3.bf16.msra.mxu0 %v657_v27  ;;  %v723_v25 = vpack.c.bf16 %v322_v24, %v321_v23  ;;  %v324_v27 = vld [vmem:[%s1046_s5 + $0x38] sm:$0xff]  ;;  %v325_v29 = vld [vmem:[%s1046_s5 + $0x40] sm:$0xff]  ;;  %v326_v30 = vld [vmem:[%s1046_s5 + $0x48] sm:$0xff] }
  0x15   :  { %659 = vmatprep.subr.bf16.mxu0 %v749_v0  ;;  %v726_v28 = vpack.c.bf16 %v324_v27, %v323_v26  ;;  %v729_v31 = vpack.c.bf16 %v326_v30, %v325_v29  ;;  %v416_v32 = vld [vmem:[%s1047_s4] ss:$0 sm:$0xff]  ;;  %v328_v38 = vld [vmem:[%s1046_s5 + $0x58] sm:$0xff]  ;;  %v331_v43 = vld [vmem:[%s1046_s5 + $0x70] sm:$0xff] }
  0x16   :  { %682 = vmatpush3.bf16.msra.mxu1 %v681_v36  ;;  %v434_v46 = vld [vmem:[%s1047_s4 + $0x1] ss:$0 sm:$0xff]  ;;  %v435_v51 = vld [vmem:[%s1048_s6] ss:$0 sm:$0xff] }
  0x17   :  { %683 = vmatprep.subr.bf16.mxu1 %v749_v0 }
  0x18   :  { %661 = vmatpush3.bf16.msra.mxu0 %v660_v33 }
  0x19   :  { %662 = vmatprep.subr.bf16.mxu0 %v749_v0 }
  0x1a   :  { %685 = vmatpush3.bf16.msra.mxu1 %v684_v44  ;;  %v332_v44 = vld [vmem:[%s1046_s5 + $0x78] sm:$0xff] }
  0x1b   :  { %686 = vmatprep.subr.bf16.mxu1 %v749_v0  ;;  %v738_v45 = vpack.c.bf16 %v332_v44, %v331_v43 }
  0x1c   :  { %664 = vmatpush3.bf16.msra.mxu0 %v663_v37  ;;  %v327_v37 = vld [vmem:[%s1046_s5 + $0x50] sm:$0xff] }
  0x1d   :  { %665 = vmatprep.subr.bf16.mxu0 %v749_v0  ;;  %v732_v39 = vpack.c.bf16 %v328_v38, %v327_v37 }
  0x1e   :  { %688 = vmatpush3.bf16.msra.mxu1 %v687_v47 }
  0x1f   :  { %689 = vmatprep.subr.bf16.mxu1 %v749_v0 }
  0x20   :  { %667 = vmatpush3.bf16.msra.mxu0 %v666_v40  ;;  %v329_v40 = vld [vmem:[%s1046_s5 + $0x60] sm:$0xff] }
  0x21   :  { %692 = vmatprep.subr.bf16.mxu0 %v749_v0 }
  0x22   :  { %691 = vmatpush3.bf16.msra.mxu1 %v690_v50 }
  0x23   :  { %537 = vmatmul.mubr.f32.vlgmr.msra.gmra.mrb[0].mxu0 %v43_v41  ;;  %716 = vmatprep.subr.bf16.mxu1 %v749_v0  ;;  %v330_v41 = vld [vmem:[%s1046_s5 + $0x68] sm:$0xff] }
  0x24   :  { %606 = vmatprep.mubr.msk.f32.mxu0 %vm750_vm0, %v751_v4  ;;  %694 = vmatpush3.bf16.msra.mxu0 %v693_v54  ;;  %v735_v42 = vpack.c.bf16 %v330_v41, %v329_v40 }
  0x25   :  { %695 = vmatprep.subr.bf16.mxu0 %v749_v0 }
  0x28   :  { %697 = vmatpush3.bf16.msra.mxu0 %v696_v56 }
  0x29   :  { %698 = vmatprep.subr.bf16.mxu0 %v749_v0 }
  0x2c   :  { %700 = vmatpush3.bf16.msra.mxu0 %v699_v59 }
  0x2d   :  { %701 = vmatprep.subr.bf16.mxu0 %v749_v0 }
  0x30   :  { %703 = vmatpush3.bf16.msra.mxu0 %v702_v62 }
  0x31   :  { %704 = vmatprep.subr.bf16.mxu0 %v749_v0 }
  0x34   :  { %706 = vmatpush3.bf16.msra.mxu0 %v705_v2 }
  0x35   :  { %707 = vmatprep.subr.bf16.mxu0 %v749_v0 }
  0x38   :  { %709 = vmatpush3.bf16.msra.mxu0 %v708_v11 }
  0x39   :  { %710 = vmatprep.subr.bf16.mxu0 %v749_v0 }
  0xf6   :  { %v116_v5 = vpop.f32.mrb[0].mxu0 }
  0xf7   :  { %v117_v6 = vadd.f32 %v415_v3, %v116_v5  ;;  %v538_v7 = vpop.f32.mrb[1].mxu0 }
  0xf9   :  { %743 = vtanh.f32 %v117_v6 }
 0x103   :  { %v744_v8 = vpop.eup %743 }
 0x104   :  { %572 = vmatmul.mubr.f32.vlgmr.msra.gmra.mrb[0].mxu1 %v744_v8 }
 0x105   :  { %641 = vmatprep.mubr.msk.f32.mxu1 %vm750_vm0, %v751_v4  ;;  %v711_v4 = vpack.c.bf16 %v430_v13, %v429_v12  ;;  %718 = vmatpush3.bf16.msra.mxu1 %v717_v20 }
 0x106   :  { %719 = vmatprep.subr.bf16.mxu1 %v749_v0 }
 0x107   :  { %712 = vmatpush3.bf16.msra.mxu0 %v711_v4 }
 0x108   :  { %713 = vmatprep.subr.bf16.mxu0 %v749_v0 }
 0x109   :  { %721 = vmatpush3.bf16.msra.mxu1 %v720_v22 }
 0x10a   :  { %722 = vmatprep.subr.bf16.mxu1 %v749_v0 }
 0x10b   :  { %715 = vmatpush3.bf16.msra.mxu0 %v714_v16 }
 0x10d   :  { %724 = vmatpush3.bf16.msra.mxu1 %v723_v25 }
 0x10e   :  { %725 = vmatprep.subr.bf16.mxu1 %v749_v0 }
 0x111   :  { %727 = vmatpush3.bf16.msra.mxu1 %v726_v28 }
 0x112   :  { %728 = vmatprep.subr.bf16.mxu1 %v749_v0 }
 0x115   :  { %730 = vmatpush3.bf16.msra.mxu1 %v729_v31 }
 0x116   :  { %731 = vmatprep.subr.bf16.mxu1 %v749_v0 }
 0x119   :  { %733 = vmatpush3.bf16.msra.mxu1 %v732_v39 }
 0x11a   :  { %734 = vmatprep.subr.bf16.mxu1 %v749_v0 }
 0x11d   :  { %736 = vmatpush3.bf16.msra.mxu1 %v735_v42 }
 0x11e   :  { %737 = vmatprep.subr.bf16.mxu1 %v749_v0 }
 0x121   :  { %739 = vmatpush3.bf16.msra.mxu1 %v738_v45 }
 0x1d7   :  { %v212_v33 = vpop.f32.mrb[0].mxu1 }
 0x1d8   :  { %v213_v34 = vadd.f32 %v416_v32, %v212_v33  ;;  %v573_v35 = vpop.f32.mrb[1].mxu1 }
 0x1da   :  { %745 = vtanh.f32 %v213_v34 }
 0x1e4   :  { %v746_v36 = vpop.eup %745 }
 0x1e5   :  { %607 = vmatmul.mubr.f32.vlgmr.msra.gmra.mrb[2].mxu0 %v746_v36 }
 0x2b8   :  { %v310_v47 = vpop.f32.mrb[2].mxu0 }
 0x2b9   :  { %v311_v48 = vadd.f32 %v434_v46, %v310_v47  ;;  %v608_v49 = vpop.f32.mrb[3].mxu0 }
 0x2bb   :  { %747 = vtanh.f32 %v311_v48 }
 0x2c5   :  { %v748_v50 = vpop.eup %747 }
 0x2c6   :  { %642 = vmatmul.mubr.f32.vlgmr.msra.gmra.mrb[2].mxu1 %v748_v50 }
 0x399   :  { %v406_v52 = vpop.f32.mrb[2].mxu1 }
 0x39a   :  { %v407_v53 = vadd.f32 %v435_v51, %v406_v52  ;;  %v643_v54 = vpop.f32.mrb[3].mxu1 }
 0x39c   :  { %410 = vst [vmem:[%s1049_s7] sm:$0xff] %v407_v53 }

</bundles_post_ra>
